<compile_context>
chip_gen: v5e
topology: v5e:2x2
jax: 0.10.0
libtpu: 0.0.40
codegen_flags: <defaults>
</compile_context>

<pallas_src>
import functools

import jax
import jax.numpy as jnp
from jax.experimental import pallas as pl
from jax.experimental.pallas import tpu as pltpu


def _round_up(x, m):
    return ((x + m - 1) // m) * m


def _cdiv(a, b):
    return -(-a // b)


def _softplus(x):
    # Matches torch.nn.Softplus(beta=1, threshold=20):
    #   x                if x > 20
    #   log(1 + exp(x))  otherwise
    return jnp.where(x > 20.0, x, jnp.log1p(jnp.exp(jnp.minimum(x, 20.0))))


def _evidence_kernel(num_layers, d_in_pad, num_classes,
                     x_ref, w_ref, b_ref, o_ref):
    """One batch tile of the fused MLP.

    x_ref: (TILE_B, d_in_pad)        f32    input rows for this tile
    w_ref: (d_in_pad + H*(L-1), H)   bf16   all layer weights stacked along rows
    b_ref: (L, H)                    f32    all layer biases
    o_ref: (TILE_B, num_classes)     f32    narrow real output (no padded lanes)
    """
    H = w_ref.shape[-1]
    h = x_ref[...].astype(jnp.bfloat16)    # cast on VPU; bf16 feeds the MXU
    row = 0
    in_dim = d_in_pad
    for i in range(num_layers):
        w = w_ref[pl.ds(row, in_dim), :]                       # bf16 (in_dim, H)
        b = b_ref[pl.ds(i, 1), :]                              # f32  (1, H)
        acc = jnp.dot(h, w, preferred_element_type=jnp.float32)  # MXU, f32 acc
        acc = acc + b                                          # f32 elementwise
        if i < num_layers - 1:
            # ReLU, then keep activations bf16 (halves vreg/spill pressure).
            h = jnp.maximum(acc, 0.0).astype(jnp.bfloat16)
            # TODO(synk): Dropout(p=0.1) is identity (eval/inference semantics);
            #             training-mode PRNG mask not implemented.
        else:
            # Softplus only on the real classes; padded columns never hit HBM.
            o_ref[...] = _softplus(acc[:, :num_classes])
        row += in_dim
        in_dim = H


def pack_params(weights, biases):
    """Pack per-layer params ONCE (hoisted out of the forward path).

    weights: list of [in_i, out_i] float32 matrices ([in, out] = torch weight.T)
    biases:  list of [out_i]       float32 vectors
    Returns (w_packed bf16 [rows, H], b_packed f32 [L, H], meta dict).
    """
    num_layers = len(weights)
    d_in = weights[0].shape[0]
    num_classes = weights[-1].shape[1]

    # Lane-dense padded feature width shared by every hidden layer.
    H = _round_up(max([w.shape[1] for w in weights] + [128]), 128)
    d_in_pad = _round_up(d_in, 16)          # bf16 sublane-aligned row offsets

    w_rows = d_in_pad + H * (num_layers - 1)
    w_packed = jnp.zeros((w_rows, H), jnp.float32)
    b_packed = jnp.zeros((num_layers, H), jnp.float32)
    row, in_dim = 0, d_in_pad
    for i, (w, b) in enumerate(zip(weights, biases)):
        w_packed = w_packed.at[row:row + w.shape[0], :w.shape[1]].set(w)
        b_packed = b_packed.at[i, :b.shape[0]].set(b)
        row += in_dim
        in_dim = H
    meta = dict(num_layers=num_layers, d_in=d_in, d_in_pad=d_in_pad,
                num_classes=num_classes, hidden_pad=H)
    return w_packed.astype(jnp.bfloat16), b_packed, meta


def _choose_tiling(batch, *, max_tile_b=2048, min_tile_b=128):
    """Pick (tile_b, num_tiles): >=2 grid steps when worthwhile (megacore on
    v7x + pipeline overlap), tiles sized to the batch so padding waste stays
    small, capped at max_tile_b (VMEM is nowhere near binding at that size)."""
    b8 = max(8, _round_up(batch, 8))
    if b8 < 2 * min_tile_b:
        return b8, 1                               # tiny batch: single tile
    num_tiles = max(2, _cdiv(b8, max_tile_b))
    tile_b = _round_up(_cdiv(b8, num_tiles), 8)
    num_tiles = _cdiv(b8, tile_b)
    return tile_b, num_tiles


def evidence_collector_forward(x, w_packed, b_packed, *, num_layers, d_in,
                               d_in_pad, num_classes, hidden_pad,
                               max_tile_b=2048):
    """Fused EvidenceCollector forward.

    x: [B, d_in] float32. Returns [B, num_classes] float32.
    """
    batch = x.shape[0]
    assert x.shape[1] == d_in
    H = hidden_pad
    w_rows = w_packed.shape[0]

    tile_b, num_tiles = _choose_tiling(batch, max_tile_b=max_tile_b)
    b_pad = tile_b * num_tiles

    # Pad rows/cols with zeros; x stays f32 (kernel casts to bf16 at the dot).
    pad_b, pad_d = b_pad - batch, d_in_pad - d_in
    x_p = jnp.pad(x, ((0, pad_b), (0, pad_d))) if (pad_b or pad_d) else x

    kernel = functools.partial(_evidence_kernel, num_layers, d_in_pad,
                               num_classes)

    out = pl.pallas_call(
        kernel,
        out_shape=jax.ShapeDtypeStruct((b_pad, num_classes), jnp.float32),
        grid=(num_tiles,),
        in_specs=[
            pl.BlockSpec((tile_b, d_in_pad), lambda i: (i, 0)),   # x: batch-tiled
            pl.BlockSpec((w_rows, H), lambda i: (0, 0)),          # weights: resident
            pl.BlockSpec((num_layers, H), lambda i: (0, 0)),      # biases: resident
        ],
        out_specs=pl.BlockSpec((tile_b, num_classes), lambda i: (i, 0)),
        compiler_params=pltpu.CompilerParams(
            dimension_semantics=("parallel",),                    # megacore on v7x
        ),
    )(x_p, w_packed, b_packed)

    return out[:batch] if b_pad != batch else out


def init_params(key, dims, num_classes):
    """PyTorch nn.Linear default init: U(-1/sqrt(fan_in), 1/sqrt(fan_in))."""
    sizes = list(dims) + [num_classes]
    weights, biases = [], []
    for i in range(len(sizes) - 1):
        fan_in, fan_out = sizes[i], sizes[i + 1]
        key, kw, kb = jax.random.split(key, 3)
        bound = 1.0 / jnp.sqrt(fan_in)
        # stored directly in [in, out] (= PyTorch weight transposed)
        w = jax.random.uniform(kw, (fan_in, fan_out), jnp.float32, -bound, bound)
        b = jax.random.uniform(kb, (fan_out,), jnp.float32, -bound, bound)
        weights.append(w)
        biases.append(b)
    return weights, biases


def reference_forward(x, weights, biases):
    """Same math as the kernel: bf16 operands into the MXU, f32 accumulation."""
    h = x
    for i in range(len(weights)):
        h = jnp.dot(h.astype(jnp.bfloat16), weights[i].astype(jnp.bfloat16),
                    preferred_element_type=jnp.float32) + biases[i]
        if i < len(weights) - 1:
            h = jnp.maximum(h, 0.0)
    return _softplus(h)


if __name__ == "__main__":
    key = jax.random.PRNGKey(0)
    dims = [32, 64, 32]          # EvidenceCollector(dims=[32, 64, 32], num_classes=8)
    num_classes = 8

    key, kp = jax.random.split(key)
    weights, biases = init_params(kp, dims, num_classes)

    # Pack once at init (hoisted out of the per-call path).
    w_packed, b_packed, meta = pack_params(weights, biases)
    fwd = functools.partial(evidence_collector_forward,
                            w_packed=w_packed, b_packed=b_packed, **meta)

    # Small single-tile case.
    key, kx = jax.random.split(key)
    x = jax.random.normal(kx, (8, dims[0]), jnp.float32)
    out = jax.block_until_ready(fwd(x))
    ref = reference_forward(x, weights, biases)
    assert out.shape == (8, num_classes)
    assert jnp.allclose(out, ref, atol=2e-3, rtol=2e-3), (
        f"max abs err {jnp.max(jnp.abs(out - ref))}"
    )
    assert bool(jnp.all(out >= 0.0))   # softplus output is non-negative

    # Multi-tile case: exercises the batch grid (2 steps), pipelining, padding.
    key, kx2 = jax.random.split(key)
    x2 = jax.random.normal(kx2, (600, dims[0]), jnp.float32)
    out2 = jax.block_until_ready(fwd(x2))
    ref2 = reference_forward(x2, weights, biases)
    assert out2.shape == (600, num_classes)
    assert jnp.allclose(out2, ref2, atol=2e-3, rtol=2e-3), (
        f"max abs err {jnp.max(jnp.abs(out2 - ref2))}"
    )

    print("KERNEL_OK")
</pallas_src>

<mosaic_0001>
module attributes {stable_mosaic.version = 11 : i64} {
  func.func @_evidence_kernel(%arg0: i32, %arg1: memref<8x32xf32, #tpu.memory_space<vmem>>, %arg2: memref<288x128xbf16, #tpu.memory_space<vmem>>, %arg3: memref<3x128xf32, #tpu.memory_space<vmem>>, %arg4: memref<8x8xf32, #tpu.memory_space<vmem>>) attributes {dimension_semantics = [#tpu.dimension_semantics<parallel>], iteration_bounds = array<i64: 1>, scalar_prefetch = 0 : i64, scratch_operands = 0 : i64, tpu.core_type = #tpu.core_type<tc>, window_params = [{transform_indices = @transform_0, window_bounds = array<i64: 8, 32>}, {pipeline_mode = #tpu.pipeline_mode<synchronous>, transform_indices = @transform_1, window_bounds = array<i64: 288, 128>}, {pipeline_mode = #tpu.pipeline_mode<synchronous>, transform_indices = @transform_2, window_bounds = array<i64: 3, 128>}, {transform_indices = @transform_3, window_bounds = array<i64: 8, 8>}]} {
    %c0 = arith.constant 0 : index
    %c0_0 = arith.constant 0 : index
    %0 = vector.load %arg1[%c0, %c0_0] : memref<8x32xf32, #tpu.memory_space<vmem>>, vector<8x32xf32>
    %1 = arith.truncf %0 : vector<8x32xf32> to vector<8x32xbf16>
    %c0_1 = arith.constant 0 : index
    %c0_2 = arith.constant 0 : index
    %2 = vector.load %arg2[%c0_1, %c0_2] : memref<288x128xbf16, #tpu.memory_space<vmem>>, vector<32x128xbf16>
    %c0_3 = arith.constant 0 : index
    %c0_4 = arith.constant 0 : index
    %3 = vector.load %arg3[%c0_3, %c0_4] : memref<3x128xf32, #tpu.memory_space<vmem>>, vector<1x128xf32>
    %cst = arith.constant dense<0.000000e+00> : vector<8x128xf32>
    %4 = tpu.matmul %1, %2, %cst {dimension_numbers = #tpu.dot_dimension_numbers<[1], [0], [0], [1], [0, 0, 1, 1], [], []>} : vector<8x32xbf16>, vector<32x128xbf16>, vector<8x128xf32> -> vector<8x128xf32>
    %5 = vector.broadcast %3 : vector<1x128xf32> to vector<8x128xf32>
    %6 = arith.addf %4, %5 : vector<8x128xf32>
    %cst_5 = arith.constant 0.000000e+00 : f32
    %7 = vector.broadcast %cst_5 : f32 to vector<8x128xf32>
    %8 = arith.maximumf %6, %7 : vector<8x128xf32>
    %9 = arith.truncf %8 : vector<8x128xf32> to vector<8x128xbf16>
    %c32 = arith.constant 32 : index
    %c0_6 = arith.constant 0 : index
    %10 = vector.load %arg2[%c32, %c0_6] : memref<288x128xbf16, #tpu.memory_space<vmem>>, vector<128x128xbf16>
    %c1 = arith.constant 1 : index
    %c0_7 = arith.constant 0 : index
    %11 = vector.load %arg3[%c1, %c0_7] : memref<3x128xf32, #tpu.memory_space<vmem>>, vector<1x128xf32>
    %cst_8 = arith.constant dense<0.000000e+00> : vector<8x128xf32>
    %12 = tpu.matmul %9, %10, %cst_8 {dimension_numbers = #tpu.dot_dimension_numbers<[1], [0], [0], [1], [0, 0, 1, 1], [], []>} : vector<8x128xbf16>, vector<128x128xbf16>, vector<8x128xf32> -> vector<8x128xf32>
    %13 = vector.broadcast %11 : vector<1x128xf32> to vector<8x128xf32>
    %14 = arith.addf %12, %13 : vector<8x128xf32>
    %cst_9 = arith.constant 0.000000e+00 : f32
    %15 = vector.broadcast %cst_9 : f32 to vector<8x128xf32>
    %16 = arith.maximumf %14, %15 : vector<8x128xf32>
    %17 = arith.truncf %16 : vector<8x128xf32> to vector<8x128xbf16>
    %c160 = arith.constant 160 : index
    %c0_10 = arith.constant 0 : index
    %18 = vector.load %arg2[%c160, %c0_10] : memref<288x128xbf16, #tpu.memory_space<vmem>>, vector<128x128xbf16>
    %c2 = arith.constant 2 : index
    %c0_11 = arith.constant 0 : index
    %19 = vector.load %arg3[%c2, %c0_11] : memref<3x128xf32, #tpu.memory_space<vmem>>, vector<1x128xf32>
    %cst_12 = arith.constant dense<0.000000e+00> : vector<8x128xf32>
    %20 = tpu.matmul %17, %18, %cst_12 {dimension_numbers = #tpu.dot_dimension_numbers<[1], [0], [0], [1], [0, 0, 1, 1], [], []>} : vector<8x128xbf16>, vector<128x128xbf16>, vector<8x128xf32> -> vector<8x128xf32>
    %21 = vector.broadcast %19 : vector<1x128xf32> to vector<8x128xf32>
    %22 = arith.addf %20, %21 : vector<8x128xf32>
    %23 = vector.extract_strided_slice %22 {offsets = [0, 0], sizes = [8, 8], strides = [1, 1]} : vector<8x128xf32> to vector<8x8xf32>
    %cst_13 = arith.constant 2.000000e+01 : f32
    %24 = vector.broadcast %cst_13 : f32 to vector<8x8xf32>
    %25 = arith.cmpf ogt, %23, %24 : vector<8x8xf32>
    %cst_14 = arith.constant 2.000000e+01 : f32
    %26 = vector.broadcast %cst_14 : f32 to vector<8x8xf32>
    %27 = arith.minimumf %23, %26 : vector<8x8xf32>
    %28 = math.exp %27 : vector<8x8xf32>
    %29 = math.log1p %28 : vector<8x8xf32>
    %30 = arith.select %25, %23, %29 : vector<8x8xi1>, vector<8x8xf32>
    %c0_15 = arith.constant 0 : index
    %c0_16 = arith.constant 0 : index
    %31 = vector.load %arg4[%c0_15, %c0_16] : memref<8x8xf32, #tpu.memory_space<vmem>>, vector<8x8xf32>
    tpu.vector_store %arg4[%c0_15, %c0_16], %30 {strides = array<i32>} : memref<8x8xf32, #tpu.memory_space<vmem>>, vector<8x8xf32>,
    return
  }
  func.func @transform_0(%arg0: i32) -> (i32, i32) {
    %c0_i32 = arith.constant 0 : i32
    %c0_i32_0 = arith.constant 0 : i32
    return %arg0, %c0_i32 : i32, i32
  }
  func.func @transform_1(%arg0: i32) -> (i32, i32) {
    %c0_i32 = arith.constant 0 : i32
    %c0_i32_0 = arith.constant 0 : i32
    %c0_i32_1 = arith.constant 0 : i32
    return %c0_i32, %c0_i32_0 : i32, i32
  }
  func.func @transform_2(%arg0: i32) -> (i32, i32) {
    %c0_i32 = arith.constant 0 : i32
    %c0_i32_0 = arith.constant 0 : i32
    %c0_i32_1 = arith.constant 0 : i32
    return %c0_i32, %c0_i32_0 : i32, i32
  }
  func.func @transform_3(%arg0: i32) -> (i32, i32) {
    %c0_i32 = arith.constant 0 : i32
    %c0_i32_0 = arith.constant 0 : i32
    return %arg0, %c0_i32 : i32, i32
  }
}

</mosaic_0001>

<bundles_post_ra>
// kernel: tpu_custom_call.1
= control target key start
LH: loop header
LB: loop body
LE: loop exit
PB: predicated region body
PF: predicated region fallthrough
CT: control target
= control target key end

     0   :  { %8 = vsyncpa [#allocation3], 0  ;;  %s536_s0 = inlined_call_operand.hbm [shape: f32[8,32], index: 0, kind: input, shape index: {}]   ;;  %s537_s1 = inlined_call_operand.hbm [shape: bf16[288,128], index: 1, kind: input, shape index: {}]   ;;  %s538_s2 = inlined_call_operand.hbm [shape: f32[3,128], index: 2, kind: input, shape index: {}]   ;;  %s539_s3 = inlined_call_operand.hbm [shape: f32[8,8], index: 3, kind: output, shape index: {}]  }
   0x1   :  { %9 = vsyncpa [#allocation6], 0  ;;  %s26_s14 = sshll.u32 %s537_s1, 4  ;;  %s27_s14 = int_to_ptr.hbm [resolvable:$true] %s26_s14 }
   0x2   :  { %10 = vsyncpa [#allocation4], 0  ;;  %s498_s15 = smov [#allocation5]   ;;  %s16_s19 = sshll.u32 %s536_s0, 4  ;;  %s17_s19 = int_to_ptr.hbm [resolvable:$true] %s16_s19 }
   0x3   :  { %s28_s16 = sshll.u32 %s498_s15, 4  ;;  %s499_s20 = smov 64   ;;  %s29_s16 = int_to_ptr.vmem [resolvable:$true] %s28_s16 }
   0x4   :  { %s500_s21 = smov 4   ;;  %s501_s22 = smov [#allocation2]  }
   0x5   :  { %34 = dma.hbm_to_vmem [thread:$0]  %s27_s14, 2304, %s29_s16, [#allocation6], %s499_s20, %s499_s20, %s500_s21  }
   0x6   :  { %s18_s23 = sshll.u32 %s501_s22, 4  ;;  %s40_s26 = sshll.u32 %s538_s2, 4  ;;  %s19_s23 = int_to_ptr.vmem [resolvable:$true] %s18_s23  ;;  %s41_s26 = int_to_ptr.hbm [resolvable:$true] %s40_s26 }
   0x7   :  { %21 = dma.hbm_to_vmem [thread:$0]  %s17_s19, 128, %s19_s23, [#allocation3]  }
   0x8   :  { %s502_s1 = smov [#allocation7]  }
   0x9   :  { %s42_s27 = sshll.u32 %s502_s1, 4  ;;  %s43_s27 = int_to_ptr.vmem [resolvable:$true] %s42_s27 }
   0xa   :  { %45 = dma.hbm_to_vmem [thread:$0]  %s41_s26, 64, %s43_s27, [#allocation6]  }
   0xb   :  { %492 = dma.done.wait [#allocation3], 128  }
   0xc   :  { %493 = vsyncadd [#allocation3], 4294967168 }
   0xd   :  { %494 = dma.done.wait [#allocation6], 2368  }
   0xe   :  { %495 = vsyncadd [#allocation6], 4294964928  ;;  %v366_v0 = vld [vmem:[#allocation5 + $0x8] sm:$0xff]  ;;  %v365_v2 = vld [vmem:[#allocation5] sm:$0xff]  ;;  %vm79_vm0 = vcmask 261120   ;;  %s503_s0 = smov [#allocation8]  }
   0xf   :  { %v374_v1 = vld [vmem:[#allocation5 + $0x48] sm:$0xff]  ;;  %89 = vmatpush.bf16.msra.mxu0 %v366_v0  ;;  %v59_v3 = vld [vmem:[#allocation2] sm:$0xff]  ;;  %v373_v4 = vld [vmem:[#allocation5 + $0x40] sm:$0xff]  ;;  %s279_s2 = sshll.u32 %s503_s0, 4  ;;  %s281_s30 = sshll.u32 %s539_s3, 4  ;;  %vm272_vm2 = vcmask 64512   ;;  %s280_s2 = int_to_ptr.vmem [resolvable:$true] %s279_s2  ;;  %s282_s30 = int_to_ptr.hbm [resolvable:$true] %s281_s30 }
  0x10   :  { %164 = vmatpush.bf16.msra.mxu1 %v374_v1  ;;  %v60_v5 = vpack.c.bf16 %v59_v3, %v59_v3  ;;  %v372_v6 = vld [vmem:[#allocation5 + $0x38] sm:$0xff]  ;;  %v371_v7 = vld [vmem:[#allocation5 + $0x30] sm:$0xff]  ;;  %v370_v8 = vld [vmem:[#allocation5 + $0x28] sm:$0xff] }
  0x11   :  { %v369_v9 = vld [vmem:[#allocation5 + $0x20] sm:$0xff]  ;;  %v368_v10 = vld [vmem:[#allocation5 + $0x18] sm:$0xff]  ;;  %v367_v11 = vld [vmem:[#allocation5 + $0x10] sm:$0xff] }
  0x12   :  { %v382_v12 = vld [vmem:[#allocation5 + $0x88] sm:$0xff]  ;;  %v381_v13 = vld [vmem:[#allocation5 + $0x80] sm:$0xff]  ;;  %v380_v14 = vld [vmem:[#allocation5 + $0x78] sm:$0xff] }
  0x13   :  { %90 = vmatpush.bf16.msra.mxu0 %v365_v2  ;;  %245 = vmatpush.bf16.msra.mxu2 %v382_v12  ;;  %v379_v15 = vld [vmem:[#allocation5 + $0x70] sm:$0xff]  ;;  %v378_v16 = vld [vmem:[#allocation5 + $0x68] sm:$0xff]  ;;  %v377_v17 = vld [vmem:[#allocation5 + $0x60] sm:$0xff] }
  0x14   :  { %165 = vmatpush.bf16.msra.mxu1 %v373_v4  ;;  %v389_v18 = vld [vmem:[#allocation7] ss:$0 sm:$0xff]  ;;  %v376_v24 = vld [vmem:[#allocation5 + $0x58] sm:$0xff]  ;;  %v390_v26 = vld [vmem:[#allocation7 + $0x1] ss:$0 sm:$0xff] }
  0x15   :  { %v375_v25 = vld [vmem:[#allocation5 + $0x50] sm:$0xff] }
  0x16   :  { %300 = vmatmul.msk.bf16.vlgmr.msra.gmra.mxu0 %vm79_vm0, %v60_v5  ;;  %v391_v32 = vld [vmem:[#allocation7 + $0x2] ss:$0 sm:$0xff] }
  0x17   :  { %246 = vmatpush.bf16.msra.mxu2 %v381_v13 }
  0x18   :  { %166 = vmatpush.bf16.msra.mxu1 %v372_v6 }
  0x1b   :  { %247 = vmatpush.bf16.msra.mxu2 %v380_v14 }
  0x1c   :  { %167 = vmatpush.bf16.msra.mxu1 %v371_v7 }
  0x1f   :  { %248 = vmatpush.bf16.msra.mxu2 %v379_v15 }
  0x20   :  { %168 = vmatpush.bf16.msra.mxu1 %v370_v8 }
  0x23   :  { %249 = vmatpush.bf16.msra.mxu2 %v378_v16 }
  0x24   :  { %169 = vmatpush.bf16.msra.mxu1 %v369_v9 }
  0x27   :  { %250 = vmatpush.bf16.msra.mxu2 %v377_v17 }
  0x28   :  { %170 = vmatpush.bf16.msra.mxu1 %v368_v10 }
  0x2b   :  { %251 = vmatpush.bf16.msra.mxu2 %v376_v24 }
  0x2c   :  { %171 = vmatpush.bf16.msra.mxu1 %v367_v11 }
  0x2f   :  { %252 = vmatpush.bf16.msra.mxu2 %v375_v25 }
  0x93   :  { %v92_v19 = vpop.f32.mrf.mxu0 }
  0x94   :  { %v93_v20 = vadd.f32 %v389_v18, %v92_v19 }
  0x96   :  { %v96_v21 = vmax.f32 %v93_v20, 0.0 }
  0x98   :  { %v97_v22 = vpack.c.bf16 %v96_v21, %v96_v21 }
  0x9a   :  { %172 = vmatmul.bf16.vlgmr.msra.gmra.mxu1 %v97_v22 }
  0x9b   :  { %v94_v23 = vpop.f32.mrf.mxu0 }
 0x117   :  { %v173_v27 = vpop.f32.mrf.mxu1 }
 0x118   :  { %v174_v28 = vadd.f32 %v390_v26, %v173_v27 }
 0x11a   :  { %v177_v29 = vmax.f32 %v174_v28, 0.0 }
 0x11c   :  { %v178_v30 = vpack.c.bf16 %v177_v29, %v177_v29 }
 0x11e   :  { %253 = vmatmul.bf16.vlgmr.msra.gmra.mxu2 %v178_v30 }
 0x11f   :  { %v175_v31 = vpop.f32.mrf.mxu1 }
 0x1a1   :  { %v254_v33 = vpop.f32.mrf.mxu2 }
 0x1a2   :  { %v255_v34 = vadd.f32 %v391_v32, %v254_v33 }
 0x1a4   :  { %v259_v35 = vmin.f32 %v255_v34, 20.0  ;;  %vm258_vm3 = vcmp.gt.f32.partialorder %v255_v34, 20.0 }
 0x1a6   :  { %v260_v36 = vmul.f32 1.442695, %v259_v35 }
 0x1a8   :  { %392 = vpow2.f32 %v260_v36 }
 0x1a9   :  { %v256_v37 = vpop.f32.mrf.mxu2 }
 0x1ae   :  { %v393_v38 = vpop.eup %392 }
 0x1af   :  { %v262_v39 = vadd.f32 1.0, %v393_v38  ;;  %v265_v40 = vmul.f32 -0.5, %v393_v38  ;;  %v268_v42 = vand.u32 2147483647, %v393_v38 }
 0x1b1   :  { %394 = vlog2.f32 %v262_v39  ;;  %v266_v41 = vadd.f32 1.0, %v265_v40  ;;  %vm269_vm1 = vcmp.lt.f32.partialorder %v268_v42, 0.0004427343 }
 0x1b3   :  { %v267_v45 = vmul.f32 %v393_v38, %v266_v41 }
 0x1b7   :  { %v395_v43 = vpop.eup %394 }
 0x1b8   :  { %v264_v44 = vmul.f32 0.6931472, %v395_v43 }
 0x1ba   :  { %v270_v46 = vsel %vm269_vm1, %v267_v45, %v264_v44 }
 0x1bb   :  { %v271_v47 = vsel %vm258_vm3, %v255_v34, %v270_v46 }
 0x1bc   :  { %273 = vst.msk [vmem:[#allocation8] sm:$0xff] %vm272_vm2, %v271_v47 }
 0x1bd   :  { %284 = dma.vmem_to_hbm [thread:$0]  %s280_s2, 128, %s282_s30, [#allocation4]  }
 0x1be   :  { %496 = dma.done.wait [#allocation4], 128  }
 0x1bf   :  { %497 = vsyncadd [#allocation4], 4294967168 }
 0x1c0   :  { %289 = vsyncpa [#allocation3], 1 }
 0x1c1   :  { %290 = vsyncpa [#allocation6], 1 }
 0x1c2   :  { %291 = vsyncpa [#allocation4], 1 }

</bundles_post_ra>
